<compile_context>
chip_gen: v7x
topology: tpu7x:2x2x1
jax: 0.10.0
libtpu: 0.0.40
codegen_flags: <defaults>
</compile_context>

<pallas_src>
import jax
import jax.numpy as jnp
from jax.experimental import pallas as pl
from jax.experimental.pallas import tpu as pltpu


LANE = 128  # node dim and every feature dim are padded to a multiple of this


def _round_up(x, m):
    return (x + m - 1) // m * m


def _vmem_limit_bytes():
    """Generation-aware scoped-VMEM cap (headroom left for compiler scratch)."""
    cap = 64 * 1024 * 1024  # conservative fallback (v7x physical per-TC VMEM)
    try:
        cap = int(pltpu.get_tpu_info().vmem_capacity_bytes)
    except Exception:
        pass
    return min(int(cap * 0.85), cap - 8 * 1024 * 1024)


def _largest_tile(n_p, candidates=(512, 256, 128)):
    for t in candidates:
        if n_p % t == 0:
            return t
    return n_p  # unreachable: n_p is always a multiple of 128


def _a_block_spec(tm, tk):
    """A-tile BlockSpec; triple-buffered to hide the (dominant) A DMA."""
    try:
        return pl.BlockSpec((tm, tk), lambda i, k: (i, k),
                            pipeline_mode=pl.Buffered(3))
    except TypeError:
        return pl.BlockSpec((tm, tk), lambda i, k: (i, k))


# ---------------------------------------------------------------------------
# Fused single-call kernel (everything resident in VMEM).
# ---------------------------------------------------------------------------
def _make_fused_kernel(xform_first):
    """xform_first: static per-layer bools (layer1, layer2, layer3)."""

    def kernel(a_ref, x_ref, w1_ref, b1_ref, w2_ref, b2_ref, w3_ref, b3_ref,
               o_ref):
        a = a_ref[...]  # bf16 [Np, Np]

        def layer(h_bf16, w_ref, b_ref, first, relu):
            # h_bf16: bf16 [Np, Fin_p]; returns f32 [Np, Fout_p].
            if first:  # A @ (h @ W): adjacency matmul at the output width
                hw = jnp.dot(h_bf16, w_ref[...],
                             preferred_element_type=jnp.float32)
                out = jnp.dot(a, hw.astype(jnp.bfloat16),
                              preferred_element_type=jnp.float32)
            else:      # (A @ h) @ W: adjacency matmul at the input width
                ah = jnp.dot(a, h_bf16, preferred_element_type=jnp.float32)
                out = jnp.dot(ah.astype(jnp.bfloat16), w_ref[...],
                              preferred_element_type=jnp.float32)
            out = out + b_ref[...]                 # bias + ReLU stay in f32
            return jnp.maximum(out, 0.0) if relu else out

        h = layer(x_ref[...], w1_ref, b1_ref, xform_first[0], True)
        h = layer(h.astype(jnp.bfloat16), w2_ref, b2_ref, xform_first[1], True)
        out = layer(h.astype(jnp.bfloat16), w3_ref, b3_ref, xform_first[2],
                    False)
        o_ref[...] = out.astype(o_ref.dtype)       # lane-dense unmasked store

    return kernel


def _fused_forward(prep, vmem_limit):
    n_p, fin_p, h_p, c_p = prep["n_p"], prep["fin_p"], prep["h_p"], prep["c_p"]
    # Ordering decided on PADDED widths (the ones the MXU actually sees).
    xform_first = (h_p <= fin_p, True, c_p <= h_p)
    kernel = _make_fused_kernel(xform_first)

    full = lambda shape: pl.BlockSpec(shape, lambda: tuple(0 for _ in shape))
    args = (prep["a"], prep["x"], prep["w1"], prep["b1"],
            prep["w2"], prep["b2"], prep["w3"], prep["b3"])

    flops = (2 * n_p * n_p * (h_p + h_p + c_p)
             + 2 * n_p * (fin_p * h_p + h_p * h_p + h_p * c_p))
    bytes_accessed = (2 * n_p * n_p + 2 * n_p * fin_p + 4 * n_p * c_p
                      + 2 * (fin_p * h_p + h_p * h_p + h_p * c_p))

    out_p = pl.pallas_call(
        kernel,
        out_shape=jax.ShapeDtypeStruct((n_p, c_p), jnp.float32),
        in_specs=[full(arr.shape) for arr in args],
        out_specs=full((n_p, c_p)),
        compiler_params=pltpu.CompilerParams(vmem_limit_bytes=vmem_limit),
        cost_estimate=pl.CostEstimate(flops=flops, transcendentals=0,
                                      bytes_accessed=bytes_accessed),
    )(*args)
    return out_p[:prep["n"], :prep["num_classes"]]


# ---------------------------------------------------------------------------
# Row-tiled per-layer path (large graphs / dual-TC on v7x).
# ---------------------------------------------------------------------------
def _xform_kernel(h_ref, w_ref, o_ref):
    # hw = h @ W : bf16 operands, f32 MXU accumulation, stored bf16.
    o_ref[...] = jnp.dot(h_ref[...], w_ref[...],
                         preferred_element_type=jnp.float32).astype(o_ref.dtype)


def _make_agg_kernel(apply_relu):
    def kernel(a_ref, hw_ref, b_ref, o_ref, acc_ref):
        @pl.when(pl.program_id(1) == 0)
        def _():
            acc_ref[...] = jnp.zeros_like(acc_ref)

        acc_ref[...] += jnp.dot(a_ref[...], hw_ref[...],
                                preferred_element_type=jnp.float32)

        @pl.when(pl.program_id(1) == pl.num_programs(1) - 1)
        def _():
            r = acc_ref[...] + b_ref[...]
            if apply_relu:
                r = jnp.maximum(r, 0.0)
            o_ref[...] = r.astype(o_ref.dtype)

    return kernel


def _tiled_layer(a_p, h_bf16, w_p, b_p, *, relu, out_dtype, tm, tk,
                 vmem_limit):
    n_p = a_p.shape[0]
    fin_p, fout_p = w_p.shape

    # 1) transform: hw = h @ W   (row grid, "parallel" -> dual-TC on v7x)
    hw = pl.pallas_call(
        _xform_kernel,
        out_shape=jax.ShapeDtypeStruct((n_p, fout_p), jnp.bfloat16),
        grid=(n_p // tm,),
        in_specs=[pl.BlockSpec((tm, fin_p), lambda i: (i, 0)),
                  pl.BlockSpec((fin_p, fout_p), lambda i: (0, 0))],
        out_specs=pl.BlockSpec((tm, fout_p), lambda i: (i, 0)),
        compiler_params=pltpu.CompilerParams(
            dimension_semantics=("parallel",),
            vmem_limit_bytes=vmem_limit),
        cost_estimate=pl.CostEstimate(
            flops=2 * n_p * fin_p * fout_p, transcendentals=0,
            bytes_accessed=2 * n_p * (fin_p + fout_p) + 2 * fin_p * fout_p),
    )(h_bf16, w_p)

    # 2) aggregate: out = A @ hw + b (+ReLU); k reduction last, "arbitrary".
    out = pl.pallas_call(
        _make_agg_kernel(relu),
        out_shape=jax.ShapeDtypeStruct((n_p, fout_p), out_dtype),
        grid=(n_p // tm, n_p // tk),
        in_specs=[_a_block_spec(tm, tk),
                  pl.BlockSpec((tk, fout_p), lambda i, k: (k, 0)),
                  pl.BlockSpec((1, fout_p), lambda i, k: (0, 0))],
        out_specs=pl.BlockSpec((tm, fout_p), lambda i, k: (i, 0)),
        scratch_shapes=[pltpu.VMEM((tm, fout_p), jnp.float32)],
        compiler_params=pltpu.CompilerParams(
            dimension_semantics=("parallel", "arbitrary"),
            vmem_limit_bytes=vmem_limit),
        cost_estimate=pl.CostEstimate(
            flops=2 * n_p * n_p * fout_p, transcendentals=0,
            bytes_accessed=2 * n_p * n_p + 2 * n_p * fout_p + 4 * n_p * fout_p),
    )(a_p, hw, b_p)
    return out


def _tiled_forward(prep, vmem_limit, tile):
    n_p = prep["n_p"]
    t = tile if tile is not None else _largest_tile(n_p)
    tm = tk = t
    h = _tiled_layer(prep["a"], prep["x"], prep["w1"], prep["b1"],
                     relu=True, out_dtype=jnp.bfloat16, tm=tm, tk=tk,
                     vmem_limit=vmem_limit)
    h = _tiled_layer(prep["a"], h, prep["w2"], prep["b2"],
                     relu=True, out_dtype=jnp.bfloat16, tm=tm, tk=tk,
                     vmem_limit=vmem_limit)
    out = _tiled_layer(prep["a"], h, prep["w3"], prep["b3"],
                       relu=False, out_dtype=jnp.float32, tm=tm, tk=tk,
                       vmem_limit=vmem_limit)
    return out[:prep["n"], :prep["num_classes"]]


# ---------------------------------------------------------------------------
# Public API: prepare once per graph, run forward many times.
# ---------------------------------------------------------------------------
def prepare_gcn(a_norm, x, params):
    """Pad + bf16-cast A, X, weights ONCE (hoisted out of the forward pass).

    Zero padding is exact: padded A/W rows/cols contribute exact zeros, so the
    valid [:n, :num_classes] block of the result is unchanged.
    """
    w1, b1, w2, b2, w3, b3 = params
    n, in_feats = x.shape
    h_feats = w1.shape[1]
    num_classes = w3.shape[1]

    n_p = _round_up(max(n, LANE), LANE)   # node dim -> multiple of 128 lanes
    fin_p = _round_up(in_feats, LANE)
    h_p = _round_up(h_feats, LANE)
    c_p = _round_up(num_classes, LANE)

    def pad2(m, rows, cols, dtype):
        return jnp.pad(m, ((0, rows - m.shape[0]),
                           (0, cols - m.shape[1]))).astype(dtype)

    return {
        "n": n, "num_classes": num_classes,
        "n_p": n_p, "fin_p": fin_p, "h_p": h_p, "c_p": c_p,
        "a": pad2(a_norm, n_p, n_p, jnp.bfloat16),
        "x": pad2(x, n_p, fin_p, jnp.bfloat16),
        "w1": pad2(w1, fin_p, h_p, jnp.bfloat16),
        "w2": pad2(w2, h_p, h_p, jnp.bfloat16),
        "w3": pad2(w3, h_p, c_p, jnp.bfloat16),
        "b1": pad2(b1, 1, h_p, jnp.float32),
        "b2": pad2(b2, 1, h_p, jnp.float32),
        "b3": pad2(b3, 1, c_p, jnp.float32),
    }


def gcn_forward_prepared(prep, *, force_tiled=False, tile=None):
    n_p, fin_p, h_p, c_p = prep["n_p"], prep["fin_p"], prep["h_p"], prep["c_p"]
    vmem_limit = _vmem_limit_bytes()

    # Rough peak VMEM of the fused resident-A kernel: bf16 A + bf16 X +
    # a few live f32 [Np, F] intermediates + f32 output + weights.
    fused_bytes = (2 * n_p * n_p
                   + 2 * n_p * fin_p
                   + 4 * 4 * n_p * max(h_p, c_p)
                   + 4 * n_p * c_p
                   + 2 * (fin_p * h_p + h_p * h_p + h_p * c_p))
    # Fused (A read from HBM once) while it fits; stream/tiled otherwise.
    # The cutoff is generation-aware via vmem_limit (~Np 4k on v7x, ~6-7k on
    # v5e/v6e); the tiled path's "parallel" row axis uses both TCs on v7x.
    use_fused = (not force_tiled) and fused_bytes <= int(0.7 * vmem_limit)

    if use_fused:
        return _fused_forward(prep, vmem_limit)
    return _tiled_forward(prep, vmem_limit, tile)


def gcn_forward(a_norm, x, params, **kwargs):
    return gcn_forward_prepared(prepare_gcn(a_norm, x, params), **kwargs)


# ---------------------------------------------------------------------------
# Deterministic demo inputs.
# ---------------------------------------------------------------------------
def make_norm_adjacency(key, n):
    """Random undirected graph -> D^{-1/2} A D^{-1/2} (DGL norm='both')."""
    logits = jax.random.uniform(key, (n, n))
    adj = (logits > 0.6).astype(jnp.float32)
    adj = jnp.maximum(adj, adj.T)                         # symmetric
    adj = adj.at[jnp.arange(n), jnp.arange(n)].set(0.0)   # no self-loops
    deg = adj.sum(axis=1)
    d_inv_sqrt = jnp.where(deg > 0, 1.0 / jnp.sqrt(jnp.maximum(deg, 1e-12)),
                           0.0)
    return adj * d_inv_sqrt[:, None] * d_inv_sqrt[None, :]


def init_params(key, in_feats, h_feats, num_classes):
    """Glorot-uniform weights, zero biases (DGL GraphConv init)."""
    ks = jax.random.split(key, 3)

    def glorot(k, fan_in, fan_out):
        lim = jnp.sqrt(6.0 / (fan_in + fan_out))
        return jax.random.uniform(k, (fan_in, fan_out), jnp.float32, -lim, lim)

    w1 = glorot(ks[0], in_feats, h_feats)
    w2 = glorot(ks[1], h_feats, h_feats)
    w3 = glorot(ks[2], h_feats, num_classes)
    b1 = jnp.zeros((1, h_feats), jnp.float32)
    b2 = jnp.zeros((1, h_feats), jnp.float32)
    b3 = jnp.zeros((1, num_classes), jnp.float32)
    return (w1, b1, w2, b2, w3, b3)


if __name__ == "__main__":
    key = jax.random.PRNGKey(0)
    k_graph, k_feat, k_param = jax.random.split(key, 3)

    N = 16
    IN_FEATS = 8
    H_FEATS = 32
    NUM_CLASSES = 4

    a_norm = make_norm_adjacency(k_graph, N)
    x = jax.random.normal(k_feat, (N, IN_FEATS), jnp.float32)
    params = init_params(k_param, IN_FEATS, H_FEATS, NUM_CLASSES)

    # Pad/cast hoisted: done once per graph, reused across forward passes.
    prep = prepare_gcn(a_norm, x, params)
    out = gcn_forward_prepared(prep)                     # fused path
    jax.block_until_ready(out)
    assert out.shape == (N, NUM_CLASSES)

    w1, b1, w2, b2, w3, b3 = params
    bf = lambda t: t.astype(jnp.bfloat16)

    def ref_layer_bf16(a_b, h_b, w, b, relu):
        # Transform-first, bf16 operands, f32 accumulation (matches kernels).
        hw = jnp.dot(h_b, bf(w), preferred_element_type=jnp.float32)
        o = jnp.dot(a_b, bf(hw), preferred_element_type=jnp.float32) + b
        return jnp.maximum(o, 0.0) if relu else o

    # (a) Tight check against a bf16-matched reference.
    a_b = bf(a_norm)
    h = ref_layer_bf16(a_b, bf(x), w1, b1, True)
    h = ref_layer_bf16(a_b, bf(h), w2, b2, True)
    ref_bf16 = ref_layer_bf16(a_b, bf(h), w3, b3, False)
    assert jnp.allclose(out, ref_bf16, atol=2e-3, rtol=2e-3)

    # (b) Loose check against the original pure-f32 module semantics.
    h = jnp.maximum(a_norm @ x @ w1 + b1, 0.0)
    h = jnp.maximum(a_norm @ h @ w2 + b2, 0.0)
    ref_f32 = a_norm @ h @ w3 + b3
    assert jnp.allclose(out, ref_f32, atol=5e-2, rtol=5e-2)

    # (c) Exercise the row-tiled per-layer path (large-graph / dual-TC path)
    #     at a modest size with a genuine multi-tile grid.
    N2 = 512
    k2_graph, k2_feat, k2_param = jax.random.split(jax.random.PRNGKey(1), 3)
    a2 = make_norm_adjacency(k2_graph, N2)
    x2 = jax.random.normal(k2_feat, (N2, IN_FEATS), jnp.float32)
    params2 = init_params(k2_param, IN_FEATS, H_FEATS, NUM_CLASSES)
    prep2 = prepare_gcn(a2, x2, params2)
    out2 = gcn_forward_prepared(prep2, force_tiled=True, tile=256)
    jax.block_until_ready(out2)
    assert out2.shape == (N2, NUM_CLASSES)

    w1, b1, w2, b2, w3, b3 = params2
    a2_b = bf(a2)
    # bf16 activations between layers match the tiled kernels' storage dtype.
    h2 = bf(ref_layer_bf16(a2_b, bf(x2), w1, b1, True))
    h2 = bf(ref_layer_bf16(a2_b, h2, w2, b2, True))
    ref2 = ref_layer_bf16(a2_b, h2, w3, b3, False)
    assert bool(jnp.isfinite(out2).all())
    assert jnp.allclose(out2, ref2, atol=2e-2, rtol=2e-2)

    print("KERNEL_OK")
</pallas_src>

<mosaic_0001>
module attributes {stable_mosaic.version = 11 : i64} {
  func.func @kernel(%arg0: memref<128x128xbf16, #tpu.memory_space<vmem>>, %arg1: memref<128x128xbf16, #tpu.memory_space<vmem>>, %arg2: memref<128x128xbf16, #tpu.memory_space<vmem>>, %arg3: memref<1x128xf32, #tpu.memory_space<vmem>>, %arg4: memref<128x128xbf16, #tpu.memory_space<vmem>>, %arg5: memref<1x128xf32, #tpu.memory_space<vmem>>, %arg6: memref<128x128xbf16, #tpu.memory_space<vmem>>, %arg7: memref<1x128xf32, #tpu.memory_space<vmem>>, %arg8: memref<128x128xf32, #tpu.memory_space<vmem>>) attributes {dimension_semantics = [], scalar_prefetch = 0 : i64, scratch_operands = 0 : i64, tpu.core_type = #tpu.core_type<tc>} {
    %c0 = arith.constant 0 : index
    %c0_0 = arith.constant 0 : index
    %0 = vector.load %arg0[%c0, %c0_0] : memref<128x128xbf16, #tpu.memory_space<vmem>>, vector<128x128xbf16>
    %c0_1 = arith.constant 0 : index
    %c0_2 = arith.constant 0 : index
    %1 = vector.load %arg1[%c0_1, %c0_2] : memref<128x128xbf16, #tpu.memory_space<vmem>>, vector<128x128xbf16>
    %c0_3 = arith.constant 0 : index
    %c0_4 = arith.constant 0 : index
    %2 = vector.load %arg2[%c0_3, %c0_4] : memref<128x128xbf16, #tpu.memory_space<vmem>>, vector<128x128xbf16>
    %cst = arith.constant dense<0.000000e+00> : vector<128x128xf32>
    %3 = tpu.matmul %1, %2, %cst {dimension_numbers = #tpu.dot_dimension_numbers<[1], [0], [0], [1], [0, 0, 1, 1], [], []>} : vector<128x128xbf16>, vector<128x128xbf16>, vector<128x128xf32> -> vector<128x128xf32>
    %4 = arith.truncf %3 : vector<128x128xf32> to vector<128x128xbf16>
    %cst_5 = arith.constant dense<0.000000e+00> : vector<128x128xf32>
    %5 = tpu.matmul %0, %4, %cst_5 {dimension_numbers = #tpu.dot_dimension_numbers<[1], [0], [0], [1], [0, 0, 1, 1], [], []>} : vector<128x128xbf16>, vector<128x128xbf16>, vector<128x128xf32> -> vector<128x128xf32>
    %c0_6 = arith.constant 0 : index
    %c0_7 = arith.constant 0 : index
    %6 = vector.load %arg3[%c0_6, %c0_7] : memref<1x128xf32, #tpu.memory_space<vmem>>, vector<1x128xf32>
    %7 = vector.broadcast %6 : vector<1x128xf32> to vector<128x128xf32>
    %8 = arith.addf %5, %7 : vector<128x128xf32>
    %cst_8 = arith.constant 0.000000e+00 : f32
    %9 = vector.broadcast %cst_8 : f32 to vector<128x128xf32>
    %10 = arith.maximumf %8, %9 : vector<128x128xf32>
    %11 = arith.truncf %10 : vector<128x128xf32> to vector<128x128xbf16>
    %c0_9 = arith.constant 0 : index
    %c0_10 = arith.constant 0 : index
    %12 = vector.load %arg4[%c0_9, %c0_10] : memref<128x128xbf16, #tpu.memory_space<vmem>>, vector<128x128xbf16>
    %cst_11 = arith.constant dense<0.000000e+00> : vector<128x128xf32>
    %13 = tpu.matmul %11, %12, %cst_11 {dimension_numbers = #tpu.dot_dimension_numbers<[1], [0], [0], [1], [0, 0, 1, 1], [], []>} : vector<128x128xbf16>, vector<128x128xbf16>, vector<128x128xf32> -> vector<128x128xf32>
    %14 = arith.truncf %13 : vector<128x128xf32> to vector<128x128xbf16>
    %cst_12 = arith.constant dense<0.000000e+00> : vector<128x128xf32>
    %15 = tpu.matmul %0, %14, %cst_12 {dimension_numbers = #tpu.dot_dimension_numbers<[1], [0], [0], [1], [0, 0, 1, 1], [], []>} : vector<128x128xbf16>, vector<128x128xbf16>, vector<128x128xf32> -> vector<128x128xf32>
    %c0_13 = arith.constant 0 : index
    %c0_14 = arith.constant 0 : index
    %16 = vector.load %arg5[%c0_13, %c0_14] : memref<1x128xf32, #tpu.memory_space<vmem>>, vector<1x128xf32>
    %17 = vector.broadcast %16 : vector<1x128xf32> to vector<128x128xf32>
    %18 = arith.addf %15, %17 : vector<128x128xf32>
    %cst_15 = arith.constant 0.000000e+00 : f32
    %19 = vector.broadcast %cst_15 : f32 to vector<128x128xf32>
    %20 = arith.maximumf %18, %19 : vector<128x128xf32>
    %21 = arith.truncf %20 : vector<128x128xf32> to vector<128x128xbf16>
    %c0_16 = arith.constant 0 : index
    %c0_17 = arith.constant 0 : index
    %22 = vector.load %arg6[%c0_16, %c0_17] : memref<128x128xbf16, #tpu.memory_space<vmem>>, vector<128x128xbf16>
    %cst_18 = arith.constant dense<0.000000e+00> : vector<128x128xf32>
    %23 = tpu.matmul %21, %22, %cst_18 {dimension_numbers = #tpu.dot_dimension_numbers<[1], [0], [0], [1], [0, 0, 1, 1], [], []>} : vector<128x128xbf16>, vector<128x128xbf16>, vector<128x128xf32> -> vector<128x128xf32>
    %24 = arith.truncf %23 : vector<128x128xf32> to vector<128x128xbf16>
    %cst_19 = arith.constant dense<0.000000e+00> : vector<128x128xf32>
    %25 = tpu.matmul %0, %24, %cst_19 {dimension_numbers = #tpu.dot_dimension_numbers<[1], [0], [0], [1], [0, 0, 1, 1], [], []>} : vector<128x128xbf16>, vector<128x128xbf16>, vector<128x128xf32> -> vector<128x128xf32>
    %c0_20 = arith.constant 0 : index
    %c0_21 = arith.constant 0 : index
    %26 = vector.load %arg7[%c0_20, %c0_21] : memref<1x128xf32, #tpu.memory_space<vmem>>, vector<1x128xf32>
    %27 = vector.broadcast %26 : vector<1x128xf32> to vector<128x128xf32>
    %28 = arith.addf %25, %27 : vector<128x128xf32>
    %c0_22 = arith.constant 0 : index
    %c0_23 = arith.constant 0 : index
    %29 = vector.load %arg8[%c0_22, %c0_23] : memref<128x128xf32, #tpu.memory_space<vmem>>, vector<128x128xf32>
    tpu.vector_store %arg8[%c0_22, %c0_23], %28 {strides = array<i32>} : memref<128x128xf32, #tpu.memory_space<vmem>>, vector<128x128xf32>,
    return
  }
}

</mosaic_0001>

<bundles_post_ra>
// kernel: tpu_custom_call.1
= control target key start
LH: loop header
LB: loop body
LE: loop exit
PB: predicated region body
PF: predicated region fallthrough
CT: control target
= control target key end

     0   :  { %13 = vsyncpa [#allocation3], 0  ;;  %s1855_s0 = inlined_call_operand.hbm [shape: bf16[128,128], index: 0, kind: input, shape index: {}]   ;;  %s1856_s1 = inlined_call_operand.hbm [shape: bf16[128,128], index: 1, kind: input, shape index: {}]   ;;  %s1857_s2 = inlined_call_operand.hbm [shape: bf16[128,128], index: 2, kind: input, shape index: {}]   ;;  %s1858_s3 = inlined_call_operand.vmem [shape: f32[1,128], index: 3, kind: input, shape index: {}]   ;;  %s1859_s4 = inlined_call_operand.hbm [shape: bf16[128,128], index: 4, kind: input, shape index: {}]   ;;  %s1860_s5 = inlined_call_operand.vmem [shape: f32[1,128], index: 5, kind: input, shape index: {}]   ;;  %s1861_s6 = inlined_call_operand.hbm [shape: bf16[128,128], index: 6, kind: input, shape index: {}]   ;;  %s1862_s7 = inlined_call_operand.vmem [shape: f32[1,128], index: 7, kind: input, shape index: {}]   ;;  %s1863_s8 = inlined_call_operand.hbm [shape: f32[128,128], index: 8, kind: output, shape index: {}]  }
   0x1   :  { %14 = vsyncpa [#allocation6], 0 }
   0x2   :  { %15 = vsyncpa [#allocation9], 0 }
   0x3   :  { %16 = vsyncpa [#allocation4], 0  ;;  %s1650_s27 = smov [#allocation5]   ;;  %s1651_s29 = smov [#allocation8]  }
   0x4   :  { %s34_s28 = sshll.u32 %s1650_s27, 4  ;;  %s60_s30 = sshll.u32 %s1651_s29, 4  ;;  %s35_s28 = int_to_ptr.vmem [resolvable:$true] %s34_s28  ;;  %s1705_s30 = int_to_ptr.vmem [resolvable:$true] %s60_s30 }
   0x5   :  { %s1510_s11 = scalar_lea.hbm %s1856_s1, 1024 }
   0x6   :  { %p1511_p0 = scmp.ne.s32.totalorder %s1856_s1, %s1510_s11  ;;  %p1514_p1 = scmp.lt.u32.totalorder %s1510_s11, %s1856_s1 }
   0x8   :  { %p1516_p2 = pnand %p1514_p1, %p1511_p0 }
   0xa   :  { %1519 = shalt.err (!%p1516_p2)
}
   0xb   :  { %s1520_s16 = scalar_lea.vmem %s35_s28, 1024  ;;  %p1525_p4 = scmp.lt.s32.totalorder %s35_s28, %s35_s28 }
   0xc   :  { %p1521_p3 = scmp.ne.s32.totalorder %s35_s28, %s1520_s16  ;;  %p1526_p5 = scmp.lt.s32.totalorder %s1520_s16, %s1520_s16 }
   0xe   :  { %p1527_p6 = por %p1526_p5, %p1525_p4 }
  0x10   :  { %p1528_p7 = pnand %p1527_p6, %p1521_p3 }
  0x12   :  { %1531 = shalt.err (!%p1528_p7)
}
  0x13   :  { %s1652_s17 = smov 64   ;;  %s1653_s18 = smov 4  }
  0x14   :  { %40 = dma.hbm_to_vmem [thread:$0]  %s1856_s1, 1024, %s35_s28, [#allocation6], %s1652_s17, %s1652_s17, %s1653_s18  }
  0x15   :  { %s1532_s23 = scalar_lea.hbm %s1859_s4, 1024 }
  0x16   :  { %p1533_p8 = scmp.ne.s32.totalorder %s1859_s4, %s1532_s23  ;;  %p1536_p9 = scmp.lt.u32.totalorder %s1532_s23, %s1859_s4 }
  0x18   :  { %p1538_p10 = pnand %p1536_p9, %p1533_p8 }
  0x1a   :  { %1541 = shalt.err (!%p1538_p10)
}
  0x1b   :  { %s1542_s29 = scalar_lea.vmem %s1705_s30, 1024  ;;  %p1547_p12 = scmp.lt.s32.totalorder %s1705_s30, %s1705_s30 }
  0x1c   :  { %p1543_p11 = scmp.ne.s32.totalorder %s1705_s30, %s1542_s29  ;;  %p1548_p13 = scmp.lt.s32.totalorder %s1542_s29, %s1542_s29 }
  0x1e   :  { %p1549_p0 = por %p1548_p13, %p1547_p12 }
  0x20   :  { %p1550_p1 = pnand %p1549_p0, %p1543_p11 }
  0x22   :  { %1553 = shalt.err (!%p1550_p1)
}
  0x23   :  { %66 = dma.hbm_to_vmem [thread:$0]  %s1859_s4, 1024, %s1705_s30, [#allocation9], %s1652_s17, %s1652_s17, %s1653_s18  }
  0x24   :  { %s1654_s9 = smov [#allocation2]   ;;  %s1655_s11 = smov [#allocation7]  }
  0x25   :  { %s22_s10 = sshll.u32 %s1654_s9, 4  ;;  %s46_s12 = sshll.u32 %s1655_s11, 4  ;;  %s23_s10 = int_to_ptr.vmem [resolvable:$true] %s22_s10  ;;  %s1742_s12 = int_to_ptr.vmem [resolvable:$true] %s46_s12 }
  0x26   :  { %s1554_s15 = scalar_lea.hbm %s1855_s0, 1024 }
  0x27   :  { %p1555_p2 = scmp.ne.s32.totalorder %s1855_s0, %s1554_s15  ;;  %p1558_p3 = scmp.lt.u32.totalorder %s1554_s15, %s1855_s0 }
  0x29   :  { %p1560_p4 = pnand %p1558_p3, %p1555_p2 }
  0x2b   :  { %1563 = shalt.err (!%p1560_p4)
}
  0x2c   :  { %s1564_s4 = scalar_lea.vmem %s23_s10, 1024  ;;  %p1569_p6 = scmp.lt.s32.totalorder %s23_s10, %s23_s10 }
  0x2d   :  { %p1565_p5 = scmp.ne.s32.totalorder %s23_s10, %s1564_s4  ;;  %p1570_p7 = scmp.lt.s32.totalorder %s1564_s4, %s1564_s4 }
  0x2f   :  { %p1571_p8 = por %p1570_p7, %p1569_p6 }
  0x31   :  { %p1572_p9 = pnand %p1571_p8, %p1565_p5 }
  0x33   :  { %1575 = shalt.err (!%p1572_p9)
}
  0x34   :  { %28 = dma.hbm_to_vmem [thread:$0]  %s1855_s0, 1024, %s23_s10, [#allocation3], %s1652_s17, %s1652_s17, %s1653_s18  }
  0x35   :  { %s1576_s25 = scalar_lea.hbm %s1857_s2, 1024 }
  0x36   :  { %p1577_p10 = scmp.ne.s32.totalorder %s1857_s2, %s1576_s25  ;;  %p1580_p11 = scmp.lt.u32.totalorder %s1576_s25, %s1857_s2 }
  0x38   :  { %p1582_p12 = pnand %p1580_p11, %p1577_p10 }
  0x3a   :  { %1585 = shalt.err (!%p1582_p12)
}
  0x3b   :  { %s1586_s28 = scalar_lea.vmem %s1742_s12, 1024  ;;  %p1591_p0 = scmp.lt.s32.totalorder %s1742_s12, %s1742_s12 }
  0x3c   :  { %p1587_p13 = scmp.ne.s32.totalorder %s1742_s12, %s1586_s28  ;;  %p1592_p1 = scmp.lt.s32.totalorder %s1586_s28, %s1586_s28 }
  0x3e   :  { %p1593_p2 = por %p1592_p1, %p1591_p0 }
  0x40   :  { %p1594_p3 = pnand %p1593_p2, %p1587_p13 }
  0x42   :  { %1597 = shalt.err (!%p1594_p3)
}
  0x43   :  { %52 = dma.hbm_to_vmem [thread:$0]  %s1857_s2, 1024, %s1742_s12, [#allocation6], %s1652_s17, %s1652_s17, %s1653_s18  }
  0x44   :  { %s1656_s10 = smov [#allocation10]   ;;  %s1598_s15 = scalar_lea.hbm %s1861_s6, 1024 }
  0x45   :  { %s74_s11 = sshll.u32 %s1656_s10, 4  ;;  %p1599_p4 = scmp.ne.s32.totalorder %s1861_s6, %s1598_s15  ;;  %s75_s11 = int_to_ptr.vmem [resolvable:$true] %s74_s11 }
  0x46   :  { %p1602_p5 = scmp.lt.u32.totalorder %s1598_s15, %s1861_s6 }
  0x48   :  { %p1604_p6 = pnand %p1602_p5, %p1599_p4 }
  0x4a   :  { %1607 = shalt.err (!%p1604_p6)
}
  0x4b   :  { %s1608_s4 = scalar_lea.vmem %s75_s11, 1024  ;;  %p1613_p8 = scmp.lt.s32.totalorder %s75_s11, %s75_s11 }
  0x4c   :  { %p1609_p7 = scmp.ne.s32.totalorder %s75_s11, %s1608_s4  ;;  %p1614_p9 = scmp.lt.s32.totalorder %s1608_s4, %s1608_s4 }
  0x4e   :  { %p1615_p10 = por %p1614_p9, %p1613_p8 }
  0x50   :  { %p1616_p11 = pnand %p1615_p10, %p1609_p7 }
  0x52   :  { %1619 = shalt.err (!%p1616_p11)
}
  0x53   :  { %80 = dma.hbm_to_vmem [thread:$0]  %s1861_s6, 1024, %s75_s11, [#allocation9], %s1652_s17, %s1652_s17, %s1653_s18  }
  0x54   :  { %1642 = dma.done.wait [#allocation3], 1024  }
  0x55   :  { %1643 = vsyncadd [#allocation3], 4294966272 }
  0x56   :  { %1644 = dma.done.wait [#allocation6], 2048  }
  0x57   :  { %1645 = vsyncadd [#allocation6], 4294965248 }
  0x58   :  { %1646 = dma.done.wait [#allocation9], 2048  }
  0x59   :  { %1647 = vsyncadd [#allocation9], 4294965248  ;;  %v1470_v0 = vld [vmem:[#allocation7] sm:$0xff]   ;;  %v1471_v1 = vld [vmem:[#allocation7 + $0x8] sm:$0xff]  }
  0x5a   :  { %1268 = vmatprep.subr.bf16.mxu0 %v1470_v0  ;;  %v1472_v2 = vld [vmem:[#allocation7 + $0x10] sm:$0xff]   ;;  %v1473_v3 = vld [vmem:[#allocation7 + $0x18] sm:$0xff]   ;;  %v1478_v4 = vld [vmem:[#allocation5] sm:$0xff]  }
  0x5b   :  { %1269 = vmatpush3.bf16.msra.mxu0 %v1470_v0  ;;  %1284 = vmatprep.mubr.bf16.mxu0 %v1478_v4  ;;  %v1474_v5 = vld [vmem:[#allocation7 + $0x20] sm:$0xff]   ;;  %v1475_v6 = vld [vmem:[#allocation7 + $0x28] sm:$0xff]   ;;  %v1476_v7 = vld [vmem:[#allocation7 + $0x30] sm:$0xff]  }
  0x5c   :  { %1270 = vmatprep.subr.bf16.mxu0 %v1471_v1  ;;  %v1477_v8 = vld [vmem:[#allocation7 + $0x38] sm:$0xff]   ;;  %v1479_v9 = vld [vmem:[#allocation5 + $0x8] sm:$0xff]   ;;  %v1480_v10 = vld [vmem:[#allocation5 + $0x10] sm:$0xff]  }
  0x5d   :  { %v1481_v11 = vld [vmem:[#allocation5 + $0x18] sm:$0xff]   ;;  %v1482_v12 = vld [vmem:[#allocation5 + $0x20] sm:$0xff]   ;;  %v1483_v13 = vld [vmem:[#allocation5 + $0x28] sm:$0xff]  }
  0x5e   :  { %v1484_v14 = vld [vmem:[#allocation5 + $0x30] sm:$0xff]   ;;  %v1485_v15 = vld [vmem:[#allocation5 + $0x38] sm:$0xff]   ;;  %v1794_v16 = vld [vmem:[#allocation2] sm:$0xff]  }
  0x5f   :  { %1271 = vmatpush3.bf16.msra.mxu0 %v1471_v1  ;;  %1316 = vmatprep.mubr.bf16.mxu1 %v1794_v16  ;;  %v1494_v17 = vld [vmem:[#allocation8] sm:$0xff]   ;;  %v1495_v18 = vld [vmem:[#allocation8 + $0x8] sm:$0xff]   ;;  %v1496_v19 = vld [vmem:[#allocation8 + $0x10] sm:$0xff]  }
  0x60   :  { %1272 = vmatprep.subr.bf16.mxu0 %v1472_v2  ;;  %v1497_v20 = vld [vmem:[#allocation8 + $0x18] sm:$0xff]   ;;  %v1498_v21 = vld [vmem:[#allocation8 + $0x20] sm:$0xff]   ;;  %v1499_v22 = vld [vmem:[#allocation8 + $0x28] sm:$0xff]  }
  0x61   :  { %v1797_v47 = vld [vmem:[#allocation2 + $0x8] sm:$0xff]   ;;  %v1799_v48 = vld [vmem:[#allocation2 + $0x10] sm:$0xff]   ;;  %v1803_v49 = vld [vmem:[#allocation2 + $0x18] sm:$0xff]  }
  0x62   :  { %v1805_v50 = vld [vmem:[#allocation2 + $0x20] sm:$0xff]   ;;  %v1809_v51 = vld [vmem:[#allocation2 + $0x28] sm:$0xff]   ;;  %v1811_v52 = vld [vmem:[#allocation2 + $0x30] sm:$0xff]  }
  0x63   :  { %1273 = vmatpush3.bf16.msra.mxu0 %v1472_v2  ;;  %v1815_v53 = vld [vmem:[#allocation2 + $0x38] sm:$0xff]   ;;  %v1500_v54 = vld [vmem:[#allocation8 + $0x30] sm:$0xff]   ;;  %v1145_v56 = vld [vmem:[%s1858_s3] ss:$0 sm:$0xff] }
  0x64   :  { %1274 = vmatprep.subr.bf16.mxu0 %v1473_v3  ;;  %v1501_v55 = vld [vmem:[#allocation8 + $0x38] sm:$0xff]  }
  0x67   :  { %1275 = vmatpush3.bf16.msra.mxu0 %v1473_v3 }
  0x68   :  { %1276 = vmatprep.subr.bf16.mxu0 %v1474_v5 }
  0x6b   :  { %1277 = vmatpush3.bf16.msra.mxu0 %v1474_v5 }
  0x6c   :  { %1278 = vmatprep.subr.bf16.mxu0 %v1475_v6 }
  0x6f   :  { %1279 = vmatpush3.bf16.msra.mxu0 %v1475_v6 }
  0x70   :  { %1280 = vmatprep.subr.bf16.mxu0 %v1476_v7 }
  0x73   :  { %1281 = vmatpush3.bf16.msra.mxu0 %v1476_v7 }
  0x74   :  { %1282 = vmatprep.subr.bf16.mxu0 %v1477_v8 }
  0x77   :  { %1283 = vmatpush3.bf16.msra.mxu0 %v1477_v8 }
  0x78   :  { %1332 = vmatprep.subr.bf16.mxu0 %v1494_v17 }
  0x7a   :  { %1285 = vmatmul.mubr.bf16.vlgmr.msra.gmra.mrb[0].mxu0 %v1479_v9 }
  0x7b   :  { %1288 = vmatprep.mubr.bf16.mxu0 %v1480_v10  ;;  %1333 = vmatpush3.bf16.msra.mxu0 %v1494_v17 }
  0x7c   :  { %1334 = vmatprep.subr.bf16.mxu0 %v1495_v18 }
  0x7f   :  { %1335 = vmatpush3.bf16.msra.mxu0 %v1495_v18 }
  0x80   :  { %1336 = vmatprep.subr.bf16.mxu0 %v1496_v19 }
  0x82   :  { %1289 = vmatmul.mubr.bf16.gmra.mrb[4].mxu0 %v1481_v11 }
  0x83   :  { %1292 = vmatprep.mubr.bf16.mxu0 %v1482_v12  ;;  %1337 = vmatpush3.bf16.msra.mxu0 %v1496_v19 }
  0x84   :  { %1338 = vmatprep.subr.bf16.mxu0 %v1497_v20 }
  0x87   :  { %1339 = vmatpush3.bf16.msra.mxu0 %v1497_v20 }
  0x88   :  { %1340 = vmatprep.subr.bf16.mxu0 %v1498_v21 }
  0x8a   :  { %1293 = vmatmul.mubr.bf16.gmra.mrb[8].mxu0 %v1483_v13 }
  0x8b   :  { %1296 = vmatprep.mubr.bf16.mxu0 %v1484_v14  ;;  %1341 = vmatpush3.bf16.msra.mxu0 %v1498_v21 }
  0x8c   :  { %1342 = vmatprep.subr.bf16.mxu0 %v1499_v22 }
  0x8f   :  { %1343 = vmatpush3.bf16.msra.mxu0 %v1499_v22 }
  0x90   :  { %1344 = vmatprep.subr.bf16.mxu0 %v1500_v54 }
  0x92   :  { %1297 = vmatmul.mubr.bf16.gmra.mrb[12].mxu0 %v1485_v15 }
  0x93   :  { %1345 = vmatpush3.bf16.msra.mxu0 %v1500_v54 }
  0x94   :  { %1346 = vmatprep.subr.bf16.mxu0 %v1501_v55 }
  0x97   :  { %1347 = vmatpush3.bf16.msra.mxu0 %v1501_v55 }
 0x14d   :  { %v1286_v23 = vpop.f32.mrb[0].mxu0 }
 0x14e   :  { %v277_v24 = vpop.f32.mrb[1].mxu0 }
 0x14f   :  { %v1287_v25 = vpop.f32.mrb[2].mxu0 }
 0x150   :  { %v341_v26 = vpack.c.bf16 %v1287_v25, %v1286_v23  ;;  %v280_v27 = vpop.f32.mrb[3].mxu0 }
 0x151   :  { %v340_v28 = vpack.c.bf16 %v280_v27, %v277_v24 }
 0x153   :  { %1300 = vmatprep.subr.bf16.mxu1 %v340_v28 }
 0x154   :  { %1301 = vmatpush3.bf16.msra.mxu1 %v340_v28 }
 0x155   :  { %v1290_v29 = vpop.f32.mrb[4].mxu0  ;;  %1302 = vmatprep.subr.bf16.mxu1 %v341_v26 }
 0x156   :  { %v293_v30 = vpop.f32.mrb[5].mxu0 }
 0x157   :  { %v1291_v31 = vpop.f32.mrb[6].mxu0 }
 0x158   :  { %v343_v32 = vpack.c.bf16 %v1291_v31, %v1290_v29  ;;  %v296_v33 = vpop.f32.mrb[7].mxu0  ;;  %1303 = vmatpush3.bf16.msra.mxu1 %v341_v26 }
 0x159   :  { %v342_v34 = vpack.c.bf16 %v296_v33, %v293_v30 }
 0x15b   :  { %1304 = vmatprep.subr.bf16.mxu1 %v342_v34 }
 0x15c   :  { %1305 = vmatpush3.bf16.msra.mxu1 %v342_v34 }
 0x15d   :  { %v1294_v35 = vpop.f32.mrb[8].mxu0  ;;  %1306 = vmatprep.subr.bf16.mxu1 %v343_v32 }
 0x15e   :  { %v309_v36 = vpop.f32.mrb[9].mxu0 }
 0x15f   :  { %v1295_v37 = vpop.f32.mrb[10].mxu0 }
 0x160   :  { %v345_v38 = vpack.c.bf16 %v1295_v37, %v1294_v35  ;;  %v312_v39 = vpop.f32.mrb[11].mxu0  ;;  %1307 = vmatpush3.bf16.msra.mxu1 %v343_v32 }
 0x161   :  { %v344_v40 = vpack.c.bf16 %v312_v39, %v309_v36 }
 0x163   :  { %1308 = vmatprep.subr.bf16.mxu1 %v344_v40 }
 0x164   :  { %1309 = vmatpush3.bf16.msra.mxu1 %v344_v40 }
 0x165   :  { %v1298_v41 = vpop.f32.mrb[12].mxu0  ;;  %1310 = vmatprep.subr.bf16.mxu1 %v345_v38 }
 0x166   :  { %v325_v42 = vpop.f32.mrb[13].mxu0 }
 0x167   :  { %v1299_v43 = vpop.f32.mrb[14].mxu0 }
 0x168   :  { %v347_v44 = vpack.c.bf16 %v1299_v43, %v1298_v41  ;;  %v328_v45 = vpop.f32.mrb[15].mxu0  ;;  %1311 = vmatpush3.bf16.msra.mxu1 %v345_v38 }
 0x169   :  { %v346_v46 = vpack.c.bf16 %v328_v45, %v325_v42 }
 0x16b   :  { %1312 = vmatprep.subr.bf16.mxu1 %v346_v46 }
 0x16c   :  { %1313 = vmatpush3.bf16.msra.mxu1 %v346_v46 }
 0x16d   :  { %1314 = vmatprep.subr.bf16.mxu1 %v347_v44 }
 0x170   :  { %1315 = vmatpush3.bf16.msra.mxu1 %v347_v44 }
 0x173   :  { %1317 = vmatmul.mubr.bf16.vlgmr.msra.gmra.mrb[0].mxu1 %v1797_v47 }
 0x174   :  { %1320 = vmatprep.mubr.bf16.mxu1 %v1799_v48 }
 0x17b   :  { %1321 = vmatmul.mubr.bf16.gmra.mrb[4].mxu1 %v1803_v49 }
 0x17c   :  { %1324 = vmatprep.mubr.bf16.mxu1 %v1805_v50 }
 0x183   :  { %1325 = vmatmul.mubr.bf16.gmra.mrb[8].mxu1 %v1809_v51 }
 0x184   :  { %1328 = vmatprep.mubr.bf16.mxu1 %v1811_v52 }
 0x18b   :  { %1329 = vmatmul.mubr.bf16.gmra.mrb[12].mxu1 %v1815_v53 }
 0x18c   :  { %1380 = vmatprep.mubr.bf16.mxu1 %v1794_v16 }
 0x246   :  { %v1318_v57 = vpop.f32.mrb[0].mxu1 }
 0x247   :  { %v446_v58 = vadd.f32 %v1318_v57, %v1145_v56  ;;  %v437_v59 = vpop.f32.mrb[1].mxu1 }
 0x248   :  { %v438_v60 = vadd.f32 %v1145_v56, %v437_v59  ;;  %v1319_v61 = vpop.f32.mrb[2].mxu1  ;;  %v1503_v59 = vld [vmem:[#allocation10 + $0x8] sm:$0xff]  }
 0x249   :  { %v449_v62 = vadd.f32 %v1319_v61, %v1145_v56  ;;  %v440_v63 = vpop.f32.mrb[3].mxu1  ;;  %v502_v1 = vmax.f32 %v446_v58, 0.0  ;;  %v1502_v58 = vld [vmem:[#allocation10] sm:$0xff]   ;;  %v1505_v61 = vld [vmem:[#allocation10 + $0x18] sm:$0xff]  }
 0x24a   :  { %v441_v0 = vadd.f32 %v1145_v56, %v440_v63  ;;  %v500_v3 = vmax.f32 %v438_v60, 0.0  ;;  %1396 = vmatprep.subr.bf16.mxu0 %v1502_v58  ;;  %v1504_v60 = vld [vmem:[#allocation10 + $0x10] sm:$0xff]  }
 0x24b   :  { %v503_v2 = vmax.f32 %v449_v62, 0.0  ;;  %v1507_v62 = vld [vmem:[#allocation10 + $0x28] sm:$0xff]  }
 0x24c   :  { %v501_v4 = vmax.f32 %v441_v0, 0.0 }
 0x24d   :  { %v517_v5 = vpack.c.bf16 %v503_v2, %v502_v1 }
 0x24e   :  { %v516_v6 = vpack.c.bf16 %v501_v4, %v500_v3  ;;  %v1322_v7 = vpop.f32.mrb[4].mxu1 }
 0x24f   :  { %v462_v8 = vadd.f32 %v1322_v7, %v1145_v56  ;;  %v453_v9 = vpop.f32.mrb[5].mxu1 }
 0x250   :  { %v454_v10 = vadd.f32 %v1145_v56, %v453_v9  ;;  %v1323_v11 = vpop.f32.mrb[6].mxu1  ;;  %1348 = vmatprep.mubr.bf16.mxu0 %v516_v6 }
 0x251   :  { %v465_v12 = vadd.f32 %v1323_v11, %v1145_v56  ;;  %v456_v13 = vpop.f32.mrb[7].mxu1  ;;  %1349 = vmatmul.mubr.bf16.vlgmr.msra.gmra.mrb[16].mxu0 %v517_v5  ;;  %v506_v15 = vmax.f32 %v462_v8, 0.0 }
 0x252   :  { %v457_v14 = vadd.f32 %v1145_v56, %v456_v13  ;;  %v504_v18 = vmax.f32 %v454_v10, 0.0  ;;  %1397 = vmatpush3.bf16.msra.mxu0 %v1502_v58 }
 0x253   :  { %v507_v17 = vmax.f32 %v465_v12, 0.0  ;;  %1398 = vmatprep.subr.bf16.mxu0 %v1503_v59 }
 0x254   :  { %v505_v19 = vmax.f32 %v457_v14, 0.0 }
 0x255   :  { %v519_v20 = vpack.c.bf16 %v507_v17, %v506_v15 }
 0x256   :  { %v518_v21 = vpack.c.bf16 %v505_v19, %v504_v18  ;;  %v1326_v22 = vpop.f32.mrb[8].mxu1  ;;  %1399 = vmatpush3.bf16.msra.mxu0 %v1503_v59 }
 0x257   :  { %v478_v23 = vadd.f32 %v1326_v22, %v1145_v56  ;;  %v469_v24 = vpop.f32.mrb[9].mxu1  ;;  %1400 = vmatprep.subr.bf16.mxu0 %v1504_v60 }
 0x258   :  { %v470_v25 = vadd.f32 %v1145_v56, %v469_v24  ;;  %v1327_v26 = vpop.f32.mrb[10].mxu1  ;;  %1352 = vmatprep.mubr.bf16.mxu0 %v518_v21  ;;  %v1508_v24 = vld [vmem:[#allocation10 + $0x30] sm:$0xff]  }
 0x259   :  { %v481_v27 = vadd.f32 %v1327_v26, %v1145_v56  ;;  %v472_v28 = vpop.f32.mrb[11].mxu1  ;;  %1353 = vmatmul.mubr.bf16.gmra.mrb[20].mxu0 %v519_v20  ;;  %v510_v30 = vmax.f32 %v478_v23, 0.0  ;;  %v1162_v26 = vld [vmem:[%s1860_s5] ss:$0 sm:$0xff] }
 0x25a   :  { %v473_v29 = vadd.f32 %v1145_v56, %v472_v28  ;;  %v508_v32 = vmax.f32 %v470_v25, 0.0  ;;  %1401 = vmatpush3.bf16.msra.mxu0 %v1504_v60  ;;  %v1509_v25 = vld [vmem:[#allocation10 + $0x38] sm:$0xff]  }
 0x25b   :  { %v511_v31 = vmax.f32 %v481_v27, 0.0  ;;  %1402 = vmatprep.subr.bf16.mxu0 %v1505_v61 }
 0x25c   :  { %v509_v33 = vmax.f32 %v473_v29, 0.0 }
 0x25d   :  { %v521_v34 = vpack.c.bf16 %v511_v31, %v510_v30 }
 0x25e   :  { %v520_v35 = vpack.c.bf16 %v509_v33, %v508_v32  ;;  %v1330_v36 = vpop.f32.mrb[12].mxu1  ;;  %1403 = vmatpush3.bf16.msra.mxu0 %v1505_v61 }
 0x25f   :  { %v494_v37 = vadd.f32 %v1330_v36, %v1145_v56  ;;  %v485_v38 = vpop.f32.mrb[13].mxu1 }
 0x260   :  { %v486_v39 = vadd.f32 %v1145_v56, %v485_v38  ;;  %v1331_v40 = vpop.f32.mrb[14].mxu1  ;;  %1356 = vmatprep.mubr.bf16.mxu0 %v520_v35 }
 0x261   :  { %v497_v41 = vadd.f32 %v1331_v40, %v1145_v56  ;;  %v488_v42 = vpop.f32.mrb[15].mxu1  ;;  %1357 = vmatmul.mubr.bf16.gmra.mrb[24].mxu0 %v521_v34  ;;  %v514_v44 = vmax.f32 %v494_v37, 0.0 }
 0x262   :  { %v489_v43 = vadd.f32 %v1145_v56, %v488_v42  ;;  %v512_v46 = vmax.f32 %v486_v39, 0.0  ;;  %v1506_v56 = vld [vmem:[#allocation10 + $0x20] sm:$0xff]  }
 0x263   :  { %v515_v45 = vmax.f32 %v497_v41, 0.0  ;;  %1404 = vmatprep.subr.bf16.mxu0 %v1506_v56 }
 0x264   :  { %v513_v54 = vmax.f32 %v489_v43, 0.0  ;;  %1405 = vmatpush3.bf16.msra.mxu0 %v1506_v56 }
 0x265   :  { %v523_v55 = vpack.c.bf16 %v515_v45, %v514_v44  ;;  %1406 = vmatprep.subr.bf16.mxu0 %v1507_v62 }
 0x266   :  { %v522_v57 = vpack.c.bf16 %v513_v54, %v512_v46 }
 0x268   :  { %1360 = vmatprep.mubr.bf16.mxu0 %v522_v57  ;;  %1407 = vmatpush3.bf16.msra.mxu0 %v1507_v62 }
 0x269   :  { %1361 = vmatmul.mubr.bf16.gmra.mrb[28].mxu0 %v523_v55  ;;  %1408 = vmatprep.subr.bf16.mxu0 %v1508_v24 }
 0x26c   :  { %1409 = vmatpush3.bf16.msra.mxu0 %v1508_v24 }
 0x26d   :  { %1410 = vmatprep.subr.bf16.mxu0 %v1509_v25 }
 0x270   :  { %1411 = vmatpush3.bf16.msra.mxu0 %v1509_v25 }
 0x324   :  { %v1350_v63 = vpop.f32.mrb[16].mxu0 }
 0x325   :  { %v622_v0 = vpop.f32.mrb[17].mxu0 }
 0x326   :  { %v1351_v1 = vpop.f32.mrb[18].mxu0 }
 0x327   :  { %v686_v2 = vpack.c.bf16 %v1351_v1, %v1350_v63  ;;  %v625_v3 = vpop.f32.mrb[19].mxu0 }
 0x328   :  { %v685_v4 = vpack.c.bf16 %v625_v3, %v622_v0 }
 0x32a   :  { %1364 = vmatprep.subr.bf16.mxu1 %v685_v4 }
 0x32b   :  { %1365 = vmatpush3.bf16.msra.mxu1 %v685_v4 }
 0x32c   :  { %v1354_v5 = vpop.f32.mrb[20].mxu0  ;;  %1366 = vmatprep.subr.bf16.mxu1 %v686_v2 }
 0x32d   :  { %v638_v6 = vpop.f32.mrb[21].mxu0 }
 0x32e   :  { %v1355_v7 = vpop.f32.mrb[22].mxu0 }
 0x32f   :  { %v688_v8 = vpack.c.bf16 %v1355_v7, %v1354_v5  ;;  %v641_v9 = vpop.f32.mrb[23].mxu0  ;;  %1367 = vmatpush3.bf16.msra.mxu1 %v686_v2 }
 0x330   :  { %v687_v10 = vpack.c.bf16 %v641_v9, %v638_v6 }
 0x332   :  { %1368 = vmatprep.subr.bf16.mxu1 %v687_v10 }
 0x333   :  { %1369 = vmatpush3.bf16.msra.mxu1 %v687_v10 }
 0x334   :  { %v1358_v11 = vpop.f32.mrb[24].mxu0  ;;  %1370 = vmatprep.subr.bf16.mxu1 %v688_v8 }
 0x335   :  { %v654_v12 = vpop.f32.mrb[25].mxu0 }
 0x336   :  { %v1359_v13 = vpop.f32.mrb[26].mxu0 }
 0x337   :  { %v690_v14 = vpack.c.bf16 %v1359_v13, %v1358_v11  ;;  %v657_v15 = vpop.f32.mrb[27].mxu0  ;;  %1371 = vmatpush3.bf16.msra.mxu1 %v688_v8 }
 0x338   :  { %v689_v17 = vpack.c.bf16 %v657_v15, %v654_v12 }
 0x33a   :  { %1372 = vmatprep.subr.bf16.mxu1 %v689_v17 }
 0x33b   :  { %1373 = vmatpush3.bf16.msra.mxu1 %v689_v17 }
 0x33c   :  { %v1362_v18 = vpop.f32.mrb[28].mxu0  ;;  %1374 = vmatprep.subr.bf16.mxu1 %v690_v14 }
 0x33d   :  { %v670_v19 = vpop.f32.mrb[29].mxu0 }
 0x33e   :  { %v1363_v20 = vpop.f32.mrb[30].mxu0 }
 0x33f   :  { %v692_v21 = vpack.c.bf16 %v1363_v20, %v1362_v18  ;;  %v673_v22 = vpop.f32.mrb[31].mxu0  ;;  %1375 = vmatpush3.bf16.msra.mxu1 %v690_v14 }
 0x340   :  { %v691_v23 = vpack.c.bf16 %v673_v22, %v670_v19 }
 0x342   :  { %1376 = vmatprep.subr.bf16.mxu1 %v691_v23 }
 0x343   :  { %1377 = vmatpush3.bf16.msra.mxu1 %v691_v23 }
 0x344   :  { %1378 = vmatprep.subr.bf16.mxu1 %v692_v21 }
 0x347   :  { %1379 = vmatpush3.bf16.msra.mxu1 %v692_v21 }
 0x34a   :  { %1381 = vmatmul.mubr.bf16.vlgmr.msra.gmra.mrb[16].mxu1 %v1797_v47 }
 0x34b   :  { %1384 = vmatprep.mubr.bf16.mxu1 %v1799_v48 }
 0x352   :  { %1385 = vmatmul.mubr.bf16.gmra.mrb[20].mxu1 %v1803_v49 }
 0x353   :  { %1388 = vmatprep.mubr.bf16.mxu1 %v1805_v50 }
 0x35a   :  { %1389 = vmatmul.mubr.bf16.gmra.mrb[24].mxu1 %v1809_v51 }
 0x35b   :  { %1392 = vmatprep.mubr.bf16.mxu1 %v1811_v52 }
 0x362   :  { %1393 = vmatmul.mubr.bf16.gmra.mrb[28].mxu1 %v1815_v53 }
 0x363   :  { %1444 = vmatprep.mubr.bf16.mxu1 %v1794_v16 }
 0x41d   :  { %v1382_v27 = vpop.f32.mrb[16].mxu1 }
 0x41e   :  { %v743_v28 = vadd.f32 %v1382_v27, %v1162_v26  ;;  %v734_v29 = vpop.f32.mrb[17].mxu1 }
 0x41f   :  { %v735_v30 = vadd.f32 %v1162_v26, %v734_v29  ;;  %v1383_v31 = vpop.f32.mrb[18].mxu1 }
 0x420   :  { %v746_v32 = vadd.f32 %v1383_v31, %v1162_v26  ;;  %v737_v33 = vpop.f32.mrb[19].mxu1  ;;  %v799_v35 = vmax.f32 %v743_v28, 0.0 }
 0x421   :  { %v738_v34 = vadd.f32 %v1162_v26, %v737_v33  ;;  %v797_v36 = vmax.f32 %v735_v30, 0.0 }
 0x422   :  { %v800_v16 = vmax.f32 %v746_v32, 0.0 }
 0x423   :  { %v798_v37 = vmax.f32 %v738_v34, 0.0 }
 0x424   :  { %v814_v38 = vpack.c.bf16 %v800_v16, %v799_v35 }
 0x425   :  { %v813_v39 = vpack.c.bf16 %v798_v37, %v797_v36  ;;  %v1386_v40 = vpop.f32.mrb[20].mxu1 }
 0x426   :  { %v759_v41 = vadd.f32 %v1386_v40, %v1162_v26  ;;  %v750_v42 = vpop.f32.mrb[21].mxu1 }
 0x427   :  { %v751_v43 = vadd.f32 %v1162_v26, %v750_v42  ;;  %v1387_v44 = vpop.f32.mrb[22].mxu1  ;;  %1412 = vmatprep.mubr.bf16.mxu0 %v813_v39 }
 0x428   :  { %v762_v45 = vadd.f32 %v1387_v44, %v1162_v26  ;;  %v753_v46 = vpop.f32.mrb[23].mxu1  ;;  %1413 = vmatmul.mubr.bf16.vlgmr.msra.gmra.mrb[32].mxu0 %v814_v38  ;;  %v803_v55 = vmax.f32 %v759_v41, 0.0 }
 0x429   :  { %v754_v54 = vadd.f32 %v1162_v26, %v753_v46  ;;  %v801_v58 = vmax.f32 %v751_v43, 0.0 }
 0x42a   :  { %v804_v57 = vmax.f32 %v762_v45, 0.0 }
 0x42b   :  { %v802_v59 = vmax.f32 %v754_v54, 0.0 }
 0x42c   :  { %v816_v60 = vpack.c.bf16 %v804_v57, %v803_v55  ;;  %v1171_v57 = vld [vmem:[%s1862_s7] ss:$0 sm:$0xff]  ;;  %s1657_s7 = smov [#allocation11]  }
 0x42d   :  { %v815_v61 = vpack.c.bf16 %v802_v59, %v801_v58  ;;  %v1390_v56 = vpop.f32.mrb[24].mxu1  ;;  %s1115_s22 = sshll.u32 %s1657_s7, 4  ;;  %s1116_s22 = int_to_ptr.vmem [resolvable:$true] %s1115_s22 }
 0x42e   :  { %v775_v62 = vadd.f32 %v1390_v56, %v1162_v26  ;;  %v766_v63 = vpop.f32.mrb[25].mxu1  ;;  %s1620_s23 = scalar_lea.vmem %s1116_s22, 2048  ;;  %p1625_p13 = scmp.lt.s32.totalorder %s1116_s22, %s1116_s22 }
 0x42f   :  { %v767_v0 = vadd.f32 %v1162_v26, %v766_v63  ;;  %v1391_v1 = vpop.f32.mrb[26].mxu1  ;;  %1416 = vmatprep.mubr.bf16.mxu0 %v815_v61  ;;  %p1621_p12 = scmp.ne.s32.totalorder %s1116_s22, %s1620_s23  ;;  %p1626_p0 = scmp.lt.s32.totalorder %s1620_s23, %s1620_s23 }
 0x430   :  { %v778_v2 = vadd.f32 %v1391_v1, %v1162_v26  ;;  %v769_v3 = vpop.f32.mrb[27].mxu1  ;;  %1417 = vmatmul.mubr.bf16.gmra.mrb[36].mxu0 %v816_v60  ;;  %v807_v5 = vmax.f32 %v775_v62, 0.0 }
 0x431   :  { %v770_v4 = vadd.f32 %v1162_v26, %v769_v3  ;;  %v805_v7 = vmax.f32 %v767_v0, 0.0  ;;  %p1627_p1 = por %p1626_p0, %p1625_p13 }
 0x432   :  { %v808_v6 = vmax.f32 %v778_v2, 0.0 }
 0x433   :  { %v806_v8 = vmax.f32 %v770_v4, 0.0  ;;  %p1628_p2 = pnand %p1627_p1, %p1621_p12 }
 0x434   :  { %v818_v9 = vpack.c.bf16 %v808_v6, %v807_v5 }
 0x435   :  { %v817_v10 = vpack.c.bf16 %v806_v8, %v805_v7  ;;  %v1394_v11 = vpop.f32.mrb[28].mxu1 }
 0x436   :  { %v791_v12 = vadd.f32 %v1394_v11, %v1162_v26  ;;  %v782_v13 = vpop.f32.mrb[29].mxu1 }
 0x437   :  { %v783_v14 = vadd.f32 %v1162_v26, %v782_v13  ;;  %v1395_v15 = vpop.f32.mrb[30].mxu1  ;;  %1420 = vmatprep.mubr.bf16.mxu0 %v817_v10 }
 0x438   :  { %v794_v17 = vadd.f32 %v1395_v15, %v1162_v26  ;;  %v785_v18 = vpop.f32.mrb[31].mxu1  ;;  %1421 = vmatmul.mubr.bf16.gmra.mrb[40].mxu0 %v818_v9  ;;  %v811_v20 = vmax.f32 %v791_v12, 0.0 }
 0x439   :  { %v786_v19 = vadd.f32 %v1162_v26, %v785_v18  ;;  %v809_v22 = vmax.f32 %v783_v14, 0.0 }
 0x43a   :  { %v812_v21 = vmax.f32 %v794_v17, 0.0 }
 0x43b   :  { %v810_v23 = vmax.f32 %v786_v19, 0.0 }
 0x43c   :  { %v820_v24 = vpack.c.bf16 %v812_v21, %v811_v20 }
 0x43d   :  { %v819_v25 = vpack.c.bf16 %v810_v23, %v809_v22 }
 0x43f   :  { %1424 = vmatprep.mubr.bf16.mxu0 %v819_v25 }
 0x440   :  { %1425 = vmatmul.mubr.bf16.gmra.mrb[44].mxu0 %v820_v24 }
 0x4fb   :  { %v1414_v27 = vpop.f32.mrb[32].mxu0 }
 0x4fc   :  { %v919_v28 = vpop.f32.mrb[33].mxu0 }
 0x4fd   :  { %v1415_v29 = vpop.f32.mrb[34].mxu0 }
 0x4fe   :  { %v983_v30 = vpack.c.bf16 %v1415_v29, %v1414_v27  ;;  %v922_v31 = vpop.f32.mrb[35].mxu0 }
 0x4ff   :  { %v982_v32 = vpack.c.bf16 %v922_v31, %v919_v28 }
 0x501   :  { %1428 = vmatprep.subr.bf16.mxu1 %v982_v32 }
 0x502   :  { %1429 = vmatpush3.bf16.msra.mxu1 %v982_v32 }
 0x503   :  { %v1418_v33 = vpop.f32.mrb[36].mxu0  ;;  %1430 = vmatprep.subr.bf16.mxu1 %v983_v30 }
 0x504   :  { %v935_v34 = vpop.f32.mrb[37].mxu0 }
 0x505   :  { %v1419_v26 = vpop.f32.mrb[38].mxu0 }
 0x506   :  { %v985_v35 = vpack.c.bf16 %v1419_v26, %v1418_v33  ;;  %v938_v16 = vpop.f32.mrb[39].mxu0  ;;  %1431 = vmatpush3.bf16.msra.mxu1 %v983_v30 }
 0x507   :  { %v984_v36 = vpack.c.bf16 %v938_v16, %v935_v34 }
 0x509   :  { %1432 = vmatprep.subr.bf16.mxu1 %v984_v36 }
 0x50a   :  { %1433 = vmatpush3.bf16.msra.mxu1 %v984_v36 }
 0x50b   :  { %v1422_v37 = vpop.f32.mrb[40].mxu0  ;;  %1434 = vmatprep.subr.bf16.mxu1 %v985_v35 }
 0x50c   :  { %v951_v38 = vpop.f32.mrb[41].mxu0 }
 0x50d   :  { %v1423_v39 = vpop.f32.mrb[42].mxu0 }
 0x50e   :  { %v987_v40 = vpack.c.bf16 %v1423_v39, %v1422_v37  ;;  %v954_v41 = vpop.f32.mrb[43].mxu0  ;;  %1435 = vmatpush3.bf16.msra.mxu1 %v985_v35 }
 0x50f   :  { %v986_v42 = vpack.c.bf16 %v954_v41, %v951_v38 }
 0x511   :  { %1436 = vmatprep.subr.bf16.mxu1 %v986_v42 }
 0x512   :  { %1437 = vmatpush3.bf16.msra.mxu1 %v986_v42 }
 0x513   :  { %v1426_v43 = vpop.f32.mrb[44].mxu0  ;;  %1438 = vmatprep.subr.bf16.mxu1 %v987_v40 }
 0x514   :  { %v967_v44 = vpop.f32.mrb[45].mxu0 }
 0x515   :  { %v1427_v45 = vpop.f32.mrb[46].mxu0 }
 0x516   :  { %v989_v46 = vpack.c.bf16 %v1427_v45, %v1426_v43  ;;  %v970_v54 = vpop.f32.mrb[47].mxu0  ;;  %1439 = vmatpush3.bf16.msra.mxu1 %v987_v40 }
 0x517   :  { %v988_v55 = vpack.c.bf16 %v970_v54, %v967_v44 }
 0x519   :  { %1440 = vmatprep.subr.bf16.mxu1 %v988_v55 }
 0x51a   :  { %1441 = vmatpush3.bf16.msra.mxu1 %v988_v55 }
 0x51b   :  { %1442 = vmatprep.subr.bf16.mxu1 %v989_v46 }
 0x51e   :  { %1443 = vmatpush3.bf16.msra.mxu1 %v989_v46 }
 0x521   :  { %1445 = vmatmul.mubr.bf16.vlgmr.msra.gmra.mrb[32].mxu1 %v1797_v47 }
 0x522   :  { %1448 = vmatprep.mubr.bf16.mxu1 %v1799_v48 }
 0x529   :  { %1449 = vmatmul.mubr.bf16.gmra.mrb[36].mxu1 %v1803_v49 }
 0x52a   :  { %1452 = vmatprep.mubr.bf16.mxu1 %v1805_v50 }
 0x531   :  { %1453 = vmatmul.mubr.bf16.gmra.mrb[40].mxu1 %v1809_v51 }
 0x532   :  { %1456 = vmatprep.mubr.bf16.mxu1 %v1811_v52 }
 0x539   :  { %1457 = vmatmul.mubr.bf16.gmra.mrb[44].mxu1 %v1815_v53 }
 0x5f4   :  { %v1446_v58 = vpop.f32.mrb[32].mxu1 }
 0x5f5   :  { %v1040_v59 = vadd.f32 %v1446_v58, %v1171_v57  ;;  %v1031_v60 = vpop.f32.mrb[33].mxu1 }
 0x5f6   :  { %v1032_v47 = vadd.f32 %v1171_v57, %v1031_v60  ;;  %v1447_v61 = vpop.f32.mrb[34].mxu1 }
 0x5f7   :  { %1096 = vst [vmem:[#allocation11 + $0x10] sm:$0xff] %v1040_v59  ;;  %v1043_v48 = vadd.f32 %v1447_v61, %v1171_v57  ;;  %v1034_v49 = vpop.f32.mrb[35].mxu1 }
 0x5f8   :  { %1094 = vst [vmem:[#allocation11] sm:$0xff] %v1032_v47  ;;  %v1035_v50 = vadd.f32 %v1171_v57, %v1034_v49 }
 0x5f9   :  { %1097 = vst [vmem:[#allocation11 + $0x18] sm:$0xff] %v1043_v48 }
 0x5fa   :  { %1095 = vst [vmem:[#allocation11 + $0x8] sm:$0xff] %v1035_v50 }
 0x5fc   :  { %v1450_v51 = vpop.f32.mrb[36].mxu1 }
 0x5fd   :  { %v1056_v52 = vadd.f32 %v1450_v51, %v1171_v57  ;;  %v1047_v56 = vpop.f32.mrb[37].mxu1 }
 0x5fe   :  { %v1048_v53 = vadd.f32 %v1171_v57, %v1047_v56  ;;  %v1451_v62 = vpop.f32.mrb[38].mxu1 }
 0x5ff   :  { %1100 = vst [vmem:[#allocation11 + $0x30] sm:$0xff] %v1056_v52  ;;  %v1059_v63 = vadd.f32 %v1451_v62, %v1171_v57  ;;  %v1050_v0 = vpop.f32.mrb[39].mxu1 }
 0x600   :  { %1098 = vst [vmem:[#allocation11 + $0x20] sm:$0xff] %v1048_v53  ;;  %v1051_v1 = vadd.f32 %v1171_v57, %v1050_v0 }
 0x601   :  { %1101 = vst [vmem:[#allocation11 + $0x38] sm:$0xff] %v1059_v63 }
 0x602   :  { %1099 = vst [vmem:[#allocation11 + $0x28] sm:$0xff] %v1051_v1 }
 0x604   :  { %v1454_v2 = vpop.f32.mrb[40].mxu1 }
 0x605   :  { %v1072_v3 = vadd.f32 %v1454_v2, %v1171_v57  ;;  %v1063_v4 = vpop.f32.mrb[41].mxu1 }
 0x606   :  { %v1064_v5 = vadd.f32 %v1171_v57, %v1063_v4  ;;  %v1455_v6 = vpop.f32.mrb[42].mxu1 }
 0x607   :  { %1104 = vst [vmem:[#allocation11 + $0x50] sm:$0xff] %v1072_v3  ;;  %v1075_v7 = vadd.f32 %v1455_v6, %v1171_v57  ;;  %v1066_v8 = vpop.f32.mrb[43].mxu1 }
 0x608   :  { %1102 = vst [vmem:[#allocation11 + $0x40] sm:$0xff] %v1064_v5  ;;  %v1067_v9 = vadd.f32 %v1171_v57, %v1066_v8 }
 0x609   :  { %1105 = vst [vmem:[#allocation11 + $0x58] sm:$0xff] %v1075_v7 }
 0x60a   :  { %1103 = vst [vmem:[#allocation11 + $0x48] sm:$0xff] %v1067_v9 }
 0x60c   :  { %v1458_v10 = vpop.f32.mrb[44].mxu1 }
 0x60d   :  { %v1088_v11 = vadd.f32 %v1458_v10, %v1171_v57  ;;  %v1079_v12 = vpop.f32.mrb[45].mxu1 }
 0x60e   :  { %v1080_v13 = vadd.f32 %v1171_v57, %v1079_v12  ;;  %v1459_v14 = vpop.f32.mrb[46].mxu1 }
 0x60f   :  { %1108 = vst [vmem:[#allocation11 + $0x70] sm:$0xff] %v1088_v11  ;;  %v1091_v15 = vadd.f32 %v1459_v14, %v1171_v57  ;;  %v1082_v17 = vpop.f32.mrb[47].mxu1 }
 0x610   :  { %1106 = vst [vmem:[#allocation11 + $0x60] sm:$0xff] %v1080_v13  ;;  %v1083_v18 = vadd.f32 %v1171_v57, %v1082_v17 }
 0x611   :  { %1109 = vst [vmem:[#allocation11 + $0x78] sm:$0xff] %v1091_v15 }
 0x612   :  { %1107 = vst [vmem:[#allocation11 + $0x68] sm:$0xff] %v1083_v18 }
 0x613   :  { %1631 = shalt.err (!%p1628_p2)
}
 0x614   :  { %s1632_s26 = scalar_lea.hbm %s1863_s8, 2048 }
 0x615   :  { %p1633_p3 = scmp.ne.s32.totalorder %s1863_s8, %s1632_s26  ;;  %p1636_p4 = scmp.lt.u32.totalorder %s1632_s26, %s1863_s8 }
 0x617   :  { %p1638_p5 = pnand %p1636_p4, %p1633_p3 }
 0x619   :  { %1641 = shalt.err (!%p1638_p5)
}
 0x61a   :  { %s1658_s0 = smov 128   ;;  %s1659_s9 = smov 8  }
 0x61b   :  { %1121 = dma.vmem_to_hbm [thread:$0]  %s1116_s22, 2048, %s1863_s8, [#allocation4], %s1658_s0, %s1658_s0, %s1659_s9  }
 0x61c   :  { %1648 = dma.done.wait [#allocation4], 2048  }
 0x61d   :  { %1649 = vsyncadd [#allocation4], 4294965248 }
 0x61e   :  { %1125 = vsyncpa [#allocation3], 1 }
 0x61f   :  { %1126 = vsyncpa [#allocation6], 1 }
 0x620   :  { %1127 = vsyncpa [#allocation9], 1 }
 0x621   :  { %1128 = vsyncpa [#allocation4], 1 }

</bundles_post_ra>
